<compile_context>
chip_gen: v7x
topology: tpu7x:2x2x1
jax: 0.10.0
libtpu: 0.0.40
codegen_flags: <defaults>
</compile_context>

<pallas_src>
import functools

import jax
import jax.numpy as jnp
from jax.experimental import pallas as pl
from jax.experimental.pallas import tpu as pltpu

LANES = 128
ACC_ROWS = 8                 # per-core accumulator: one f32 vreg tile (8, 128)
DEFAULT_BLOCK_ROWS = 4096    # 4096 x 128 x 4B = 2 MiB per f32 input block


def _round_up(x, m):
    return ((x + m - 1) // m) * m


def _sublane_multiple(dtype):
    # f32 -> 8, bf16/f16 -> 16, int8/bool -> 32 (packed sublane requirement)
    return max(8, 32 // jnp.dtype(dtype).itemsize)


def _default_num_parallel():
    # Only split the leading grid axis on dual-TensorCore chips (v7x).
    # On single-TC v5e/v6e it would just be a serial outer loop with extra
    # masking / accumulator cost.
    try:
        kind = jax.devices()[0].device_kind.lower()
    except Exception:
        return 1
    return 2 if ("v7" in kind or "7x" in kind) else 1


def _pt_pow(pt, gamma):
    # pt ** gamma without a transcendental pow for small integer gamma
    # (gamma == 2 by default -> a single VPU multiply).
    if float(gamma) == 2.0:
        return pt * pt
    if float(gamma) == float(int(gamma)) and int(gamma) >= 0:
        out = jnp.ones_like(pt)
        for _ in range(int(gamma)):
            out = out * pt
        return out
    return pt ** jnp.float32(gamma)


def _focal_elementwise(x, t, alpha, gamma):
    x = x.astype(jnp.float32)
    t = t.astype(jnp.float32)
    pt = (1.0 - x) * t + x * (1.0 - t)
    fw = (alpha * t + (1.0 - alpha) * (1.0 - t)) * pt ** jnp.float32(gamma)
    # binary_cross_entropy on probabilities; PyTorch clamps log() at -100.
    bce = -(t * jnp.maximum(jnp.log(x), -100.0)
            + (1.0 - t) * jnp.maximum(jnp.log(1.0 - x), -100.0))
    return bce * fw


def _focal_loss_kernel(x_ref, t_ref, out_ref, *, alpha, gamma, block_rows,
                       n_rows, steps, total_blocks, need_mask):
    c = pl.program_id(0)   # parallel axis (core split)
    s = pl.program_id(1)   # reduction axis (accumulate across blocks)

    x = x_ref[...].astype(jnp.float32)
    t = t_ref[...].astype(jnp.float32)

    # pt = (1 - p) * y + p * (1 - y)
    pt = (1.0 - x) * t + x * (1.0 - t)
    focal_weight = (alpha * t + (1.0 - alpha) * (1.0 - t)) * _pt_pow(pt, gamma)

    log_x = jnp.maximum(jnp.log(x), -100.0)
    log_1mx = jnp.maximum(jnp.log(1.0 - x), -100.0)
    bce = -(t * log_x + (1.0 - t) * log_1mx)

    fl = bce * focal_weight

    def fold(v):
        # (block_rows, 128) -> (8, 128): block_rows/8 whole-vreg VPU adds,
        # no cross-lane (XLU) work, 4 KiB writeback per core.
        return jnp.sum(v.reshape(block_rows // ACC_ROWS, ACC_ROWS, LANES),
                       axis=0)

    def accumulate(partial):
        @pl.when(s == 0)
        def _():
            out_ref[...] = partial

        @pl.when(s != 0)
        def _():
            out_ref[...] += partial

    if need_mask:
        logical_blk = c * steps + s

        # Full blocks: unmasked fast path.
        @pl.when(logical_blk < total_blocks - 1)
        def _():
            accumulate(fold(fl))

        # Last valid block (partial) and any fully out-of-range logical block
        # of the parallel split: zero the rows past the true row count so
        # garbage (incl. NaNs from log of uninitialized data) never lands in
        # the accumulator.
        @pl.when(logical_blk >= total_blocks - 1)
        def _():
            row = (logical_blk * block_rows
                   + jax.lax.broadcasted_iota(jnp.int32, fl.shape, 0))
            accumulate(fold(jnp.where(row < n_rows, fl, 0.0)))
    else:
        accumulate(fold(fl))


def focal_loss(inputs, targets, alpha=0.25, gamma=2.0,
               block_rows=DEFAULT_BLOCK_ROWS, num_parallel=None):
    """FocalLoss forward (logits=False, reduce=True). Returns a scalar f32."""
    assert inputs.shape == targets.shape
    n_elem = int(inputs.size)
    if n_elem == 0:
        return jnp.float32(0.0)

    if num_parallel is None:
        num_parallel = _default_num_parallel()

    x_flat = inputs.reshape(-1)
    t_flat = targets.reshape(-1)

    # Lane-dense prefix handled by the kernel; the <=127-element tail (if any)
    # is summed with plain jnp in the wrapper -- no full-array concatenate.
    rem = n_elem % LANES
    n_main = n_elem - rem

    total = jnp.float32(0.0)

    if n_main:
        n_rows = n_main // LANES
        x2d = (x_flat if rem == 0 else x_flat[:n_main]).reshape(n_rows, LANES)
        t2d = (t_flat if rem == 0 else t_flat[:n_main]).reshape(n_rows, LANES)

        mult = max(_sublane_multiple(x2d.dtype), _sublane_multiple(t2d.dtype))
        blk_rows = min(_round_up(block_rows, mult), _round_up(n_rows, mult))

        total_blocks = pl.cdiv(n_rows, blk_rows)
        steps = pl.cdiv(total_blocks, num_parallel)
        need_clamp = steps * num_parallel != total_blocks
        need_mask = (n_rows % blk_rows != 0) or need_clamp

        if need_clamp:
            # A trailing (fully masked) logical step re-reads a valid block.
            def in_index_map(c, s):
                return (jnp.minimum(c * steps + s, total_blocks - 1), 0)
        else:
            def in_index_map(c, s):
                return (c * steps + s, 0)

        kernel = functools.partial(
            _focal_loss_kernel, alpha=float(alpha), gamma=float(gamma),
            block_rows=blk_rows, n_rows=n_rows, steps=steps,
            total_blocks=total_blocks, need_mask=need_mask)

        partial_sums = pl.pallas_call(
            kernel,
            out_shape=jax.ShapeDtypeStruct((num_parallel * ACC_ROWS, LANES),
                                           jnp.float32),
            grid=(num_parallel, steps),
            in_specs=[
                pl.BlockSpec((blk_rows, LANES), in_index_map),
                pl.BlockSpec((blk_rows, LANES), in_index_map),
            ],
            out_specs=pl.BlockSpec((ACC_ROWS, LANES), lambda c, s: (c, 0)),
            compiler_params=pltpu.CompilerParams(
                dimension_semantics=("parallel", "arbitrary")),
        )(x2d, t2d)

        total = total + jnp.sum(partial_sums)

    if rem:
        total = total + jnp.sum(
            _focal_elementwise(x_flat[n_main:], t_flat[n_main:], alpha, gamma))

    # Mean over the TRUE element count.
    return total / jnp.float32(n_elem)


def _focal_loss_ref(inputs, targets, alpha=0.25, gamma=2.0):
    return jnp.mean(_focal_elementwise(inputs, targets, alpha, gamma))


if __name__ == "__main__":
    key = jax.random.PRNGKey(0)
    k1, k2, k3, k4 = jax.random.split(key, 4)

    # Primary case: NCHW probabilities (logits=False), as in the PyTorch module.
    B, C, H, W = 2, 4, 16, 16
    inputs = jax.nn.sigmoid(jax.random.normal(k1, (B, C, H, W), jnp.float32))
    targets = jax.random.bernoulli(k2, 0.3, (B, C, H, W)).astype(jnp.float32)

    loss = jax.block_until_ready(focal_loss(inputs, targets))
    ref = _focal_loss_ref(inputs, targets)
    assert jnp.allclose(loss, ref, rtol=1e-5, atol=1e-6), (loss, ref)

    # Ragged case: exercises the partial last row-block and the <128-elem tail.
    shape2 = (3, 5, 7, 11)   # 1155 elements -> 9 lane rows + 3 tail elements
    inputs2 = jax.nn.sigmoid(jax.random.normal(k3, shape2, jnp.float32))
    targets2 = jax.random.bernoulli(k4, 0.3, shape2).astype(jnp.float32)

    loss2 = jax.block_until_ready(focal_loss(inputs2, targets2))
    ref2 = _focal_loss_ref(inputs2, targets2)
    assert jnp.allclose(loss2, ref2, rtol=1e-5, atol=1e-6), (loss2, ref2)

    print("KERNEL_OK")
</pallas_src>

<mosaic_0001>
module attributes {stable_mosaic.version = 11 : i64} {
  func.func @_focal_loss_kernel(%arg0: i32, %arg1: i32, %arg2: memref<16x128xf32, #tpu.memory_space<vmem>>, %arg3: memref<16x128xf32, #tpu.memory_space<vmem>>, %arg4: memref<8x128xf32, #tpu.memory_space<vmem>>) attributes {dimension_semantics = [#tpu.dimension_semantics<parallel>, #tpu.dimension_semantics<arbitrary>], iteration_bounds = array<i64: 1, 1>, scalar_prefetch = 0 : i64, scratch_operands = 0 : i64, tpu.core_type = #tpu.core_type<tc>, window_params = [{transform_indices = @transform_0, window_bounds = array<i64: 16, 128>}, {transform_indices = @transform_1, window_bounds = array<i64: 16, 128>}, {transform_indices = @transform_2, window_bounds = array<i64: 8, 128>}]} {
    %c0 = arith.constant 0 : index
    %c0_0 = arith.constant 0 : index
    %0 = vector.load %arg2[%c0, %c0_0] : memref<16x128xf32, #tpu.memory_space<vmem>>, vector<16x128xf32>
    %c0_1 = arith.constant 0 : index
    %c0_2 = arith.constant 0 : index
    %1 = vector.load %arg3[%c0_1, %c0_2] : memref<16x128xf32, #tpu.memory_space<vmem>>, vector<16x128xf32>
    %cst = arith.constant 1.000000e+00 : f32
    %2 = vector.broadcast %cst : f32 to vector<16x128xf32>
    %3 = arith.subf %2, %0 : vector<16x128xf32>
    %4 = arith.mulf %3, %1 : vector<16x128xf32>
    %cst_3 = arith.constant 1.000000e+00 : f32
    %5 = vector.broadcast %cst_3 : f32 to vector<16x128xf32>
    %6 = arith.subf %5, %1 : vector<16x128xf32>
    %7 = arith.mulf %0, %6 : vector<16x128xf32>
    %8 = arith.addf %4, %7 : vector<16x128xf32>
    %cst_4 = arith.constant 2.500000e-01 : f32
    %9 = vector.broadcast %cst_4 : f32 to vector<16x128xf32>
    %10 = arith.mulf %9, %1 : vector<16x128xf32>
    %cst_5 = arith.constant 1.000000e+00 : f32
    %11 = vector.broadcast %cst_5 : f32 to vector<16x128xf32>
    %12 = arith.subf %11, %1 : vector<16x128xf32>
    %cst_6 = arith.constant 7.500000e-01 : f32
    %13 = vector.broadcast %cst_6 : f32 to vector<16x128xf32>
    %14 = arith.mulf %13, %12 : vector<16x128xf32>
    %15 = arith.addf %10, %14 : vector<16x128xf32>
    %16 = arith.mulf %8, %8 : vector<16x128xf32>
    %17 = arith.mulf %15, %16 : vector<16x128xf32>
    %18 = math.log %0 : vector<16x128xf32>
    %cst_7 = arith.constant -1.000000e+02 : f32
    %19 = vector.broadcast %cst_7 : f32 to vector<16x128xf32>
    %20 = arith.maximumf %18, %19 : vector<16x128xf32>
    %cst_8 = arith.constant 1.000000e+00 : f32
    %21 = vector.broadcast %cst_8 : f32 to vector<16x128xf32>
    %22 = arith.subf %21, %0 : vector<16x128xf32>
    %23 = math.log %22 : vector<16x128xf32>
    %cst_9 = arith.constant -1.000000e+02 : f32
    %24 = vector.broadcast %cst_9 : f32 to vector<16x128xf32>
    %25 = arith.maximumf %23, %24 : vector<16x128xf32>
    %26 = arith.mulf %1, %20 : vector<16x128xf32>
    %cst_10 = arith.constant 1.000000e+00 : f32
    %27 = vector.broadcast %cst_10 : f32 to vector<16x128xf32>
    %28 = arith.subf %27, %1 : vector<16x128xf32>
    %29 = arith.mulf %28, %25 : vector<16x128xf32>
    %30 = arith.addf %26, %29 : vector<16x128xf32>
    %cst_11 = arith.constant 0.000000e+00 : f32
    %31 = vector.broadcast %cst_11 : f32 to vector<16x128xf32>
    %32 = arith.subf %31, %30 : vector<16x128xf32>
    %33 = arith.mulf %32, %17 : vector<16x128xf32>
    %34 = vector.shape_cast %33 : vector<16x128xf32> to vector<2x8x128xf32>
    %cst_12 = arith.constant dense<0.000000e+00> : vector<8x128xf32>
    %35 = vector.multi_reduction <add>, %34, %cst_12 [0] : vector<2x8x128xf32> to vector<8x128xf32>
    %c0_i32 = arith.constant 0 : i32
    %36 = arith.cmpi eq, %arg1, %c0_i32 : i32
    %37 = arith.extui %36 : i1 to i32
    %c0_i32_13 = arith.constant 0 : i32
    %38 = arith.cmpi ne, %37, %c0_i32_13 : i32
    scf.if %38 {
      %c0_16 = arith.constant 0 : index
      %c0_17 = arith.constant 0 : index
      %42 = vector.load %arg4[%c0_16, %c0_17] : memref<8x128xf32, #tpu.memory_space<vmem>>, vector<8x128xf32>
      tpu.vector_store %arg4[%c0_16, %c0_17], %35 {strides = array<i32>} : memref<8x128xf32, #tpu.memory_space<vmem>>, vector<8x128xf32>,
    } else {
    }
    %c0_i32_14 = arith.constant 0 : i32
    %39 = arith.cmpi ne, %arg1, %c0_i32_14 : i32
    %40 = arith.extui %39 : i1 to i32
    %c0_i32_15 = arith.constant 0 : i32
    %41 = arith.cmpi ne, %40, %c0_i32_15 : i32
    scf.if %41 {
      %c0_16 = arith.constant 0 : index
      %c0_17 = arith.constant 0 : index
      %42 = vector.load %arg4[%c0_16, %c0_17] : memref<8x128xf32, #tpu.memory_space<vmem>>, vector<8x128xf32>
      %43 = arith.addf %42, %35 : vector<8x128xf32>
      %c0_18 = arith.constant 0 : index
      %c0_19 = arith.constant 0 : index
      %44 = vector.load %arg4[%c0_18, %c0_19] : memref<8x128xf32, #tpu.memory_space<vmem>>, vector<8x128xf32>
      tpu.vector_store %arg4[%c0_18, %c0_19], %43 {strides = array<i32>} : memref<8x128xf32, #tpu.memory_space<vmem>>, vector<8x128xf32>,
    } else {
    }
    return
  }
  func.func @transform_0(%arg0: i32, %arg1: i32) -> (i32, i32) {
    %c1_i32 = arith.constant 1 : i32
    %0 = arith.muli %arg0, %c1_i32 : i32
    %1 = arith.addi %0, %arg1 : i32
    %c0_i32 = arith.constant 0 : i32
    %c0_i32_0 = arith.constant 0 : i32
    return %1, %c0_i32 : i32, i32
  }
  func.func @transform_1(%arg0: i32, %arg1: i32) -> (i32, i32) {
    %c1_i32 = arith.constant 1 : i32
    %0 = arith.muli %arg0, %c1_i32 : i32
    %1 = arith.addi %0, %arg1 : i32
    %c0_i32 = arith.constant 0 : i32
    %c0_i32_0 = arith.constant 0 : i32
    return %1, %c0_i32 : i32, i32
  }
  func.func @transform_2(%arg0: i32, %arg1: i32) -> (i32, i32) {
    %c0_i32 = arith.constant 0 : i32
    %c0_i32_0 = arith.constant 0 : i32
    return %arg0, %c0_i32 : i32, i32
  }
}

</mosaic_0001>

<bundles_post_ra>
// kernel: tpu_custom_call.1
= control target key start
LH: loop header
LB: loop body
LE: loop exit
PB: predicated region body
PF: predicated region fallthrough
CT: control target
= control target key end

     0   :  { %7 = vsyncpa [#allocation3], 0  ;;  %s268_s0 = inlined_call_operand.hbm [shape: f32[16,128], index: 0, kind: input, shape index: {}]   ;;  %s269_s1 = inlined_call_operand.hbm [shape: f32[16,128], index: 1, kind: input, shape index: {}]   ;;  %s270_s2 = inlined_call_operand.hbm [shape: f32[8,128], index: 2, kind: output, shape index: {}]  }
   0x1   :  { %8 = vsyncpa [#allocation6], 0 }
   0x2   :  { %9 = vsyncpa [#allocation4], 0  ;;  %s212_s9 = smov [#allocation2]   ;;  %s140_s13 = scalar_lea.hbm %s268_s0, 256 }
   0x3   :  { %s19_s10 = sshll.u32 %s212_s9, 4  ;;  %p141_p0 = scmp.ne.s32.totalorder %s268_s0, %s140_s13  ;;  %s20_s10 = int_to_ptr.vmem [resolvable:$true] %s19_s10 }
   0x4   :  { %p144_p1 = scmp.lt.u32.totalorder %s140_s13, %s268_s0 }
   0x6   :  { %p146_p2 = pnand %p144_p1, %p141_p0 }
   0x8   :  { %149 = shalt.err (!%p146_p2)
}
   0x9   :  { %s150_s18 = scalar_lea.vmem %s20_s10, 256  ;;  %p155_p4 = scmp.lt.s32.totalorder %s20_s10, %s20_s10 }
   0xa   :  { %p151_p3 = scmp.ne.s32.totalorder %s20_s10, %s150_s18  ;;  %p156_p5 = scmp.lt.s32.totalorder %s150_s18, %s150_s18 }
   0xc   :  { %p157_p6 = por %p156_p5, %p155_p4 }
   0xe   :  { %p158_p7 = pnand %p157_p6, %p151_p3 }
  0x10   :  { %161 = shalt.err (!%p158_p7)
}
  0x11   :  { %s213_s19 = smov 128   ;;  %s214_s20 = smov 8  }
  0x12   :  { %25 = dma.hbm_to_vmem [thread:$0]  %s268_s0, 256, %s20_s10, [#allocation3], %s213_s19, %s213_s19, %s214_s20  }
  0x13   :  { %s215_s23 = smov [#allocation5]   ;;  %s162_s27 = scalar_lea.hbm %s269_s1, 256 }
  0x14   :  { %s35_s24 = sshll.u32 %s215_s23, 4  ;;  %p163_p8 = scmp.ne.s32.totalorder %s269_s1, %s162_s27  ;;  %s36_s24 = int_to_ptr.vmem [resolvable:$true] %s35_s24 }
  0x15   :  { %p166_p9 = scmp.lt.u32.totalorder %s162_s27, %s269_s1 }
  0x17   :  { %p168_p10 = pnand %p166_p9, %p163_p8 }
  0x19   :  { %171 = shalt.err (!%p168_p10)
}
  0x1a   :  { %s172_s4 = scalar_lea.vmem %s36_s24, 256  ;;  %p177_p12 = scmp.lt.s32.totalorder %s36_s24, %s36_s24 }
  0x1b   :  { %p173_p11 = scmp.ne.s32.totalorder %s36_s24, %s172_s4  ;;  %p178_p13 = scmp.lt.s32.totalorder %s172_s4, %s172_s4 }
  0x1d   :  { %p179_p0 = por %p178_p13, %p177_p12 }
  0x1f   :  { %p180_p1 = pnand %p179_p0, %p173_p11 }
  0x21   :  { %183 = shalt.err (!%p180_p1)
}
  0x22   :  { %41 = dma.hbm_to_vmem [thread:$0]  %s269_s1, 256, %s36_s24, [#allocation6], %s213_s19, %s213_s19, %s214_s20  }
  0x23   :  { %206 = dma.done.wait [#allocation3], 256  }
  0x24   :  { %207 = vsyncadd [#allocation3], 4294967040 }
  0x25   :  { %208 = dma.done.wait [#allocation6], 256  }
  0x26   :  { %209 = vsyncadd [#allocation6], 4294967040  ;;  %v52_v0 = vld [vmem:[#allocation2] sm:$0xff]  ;;  %v53_v1 = vld [vmem:[#allocation2 + $0x8] sm:$0xff]  ;;  %s216_s1 = smov [#allocation7]  }
  0x27   :  { %v56_v2 = vsub.f32 1.0, %v52_v0  ;;  %v57_v3 = vsub.f32 1.0, %v53_v1  ;;  %132 = vlog2.f32 %v52_v0  ;;  %v54_v4 = vld [vmem:[#allocation5] sm:$0xff]  ;;  %v55_v5 = vld [vmem:[#allocation5 + $0x8] sm:$0xff]  ;;  %s117_s6 = sshll.u32 %s216_s1, 4  ;;  %s118_s6 = int_to_ptr.vmem [resolvable:$true] %s117_s6 }
  0x28   :  { %134 = vlog2.f32 %v53_v1  ;;  %v60_v6 = vsub.f32 1.0, %v54_v4  ;;  %v61_v7 = vsub.f32 1.0, %v55_v5  ;;  %v66_v16 = vmul.f32 0.25, %v54_v4  ;;  %s184_s7 = scalar_lea.vmem %s118_s6, 128  ;;  %p189_p3 = scmp.lt.s32.totalorder %s118_s6, %s118_s6 }
  0x29   :  { %136 = vlog2.f32 %v56_v2  ;;  %v58_v8 = vmul.f32 %v56_v2, %v54_v4  ;;  %v59_v10 = vmul.f32 %v57_v3, %v55_v5  ;;  %v67_v17 = vmul.f32 0.25, %v55_v5  ;;  %p185_p2 = scmp.ne.s32.totalorder %s118_s6, %s184_s7  ;;  %p190_p4 = scmp.lt.s32.totalorder %s184_s7, %s184_s7 }
  0x2a   :  { %138 = vlog2.f32 %v57_v3  ;;  %v62_v9 = vmul.f32 %v60_v6, %v52_v0  ;;  %v63_v11 = vmul.f32 %v61_v7, %v53_v1  ;;  %v68_v18 = vmul.f32 0.75, %v60_v6 }
  0x2b   :  { %v69_v21 = vmul.f32 0.75, %v61_v7  ;;  %p191_p5 = por %p190_p4, %p189_p3 }
  0x2c   :  { %v64_v15 = vadd.f32 %v62_v9, %v58_v8  ;;  %v65_v20 = vadd.f32 %v63_v11, %v59_v10  ;;  %v70_v28 = vadd.f32 %v68_v18, %v66_v16 }
  0x2d   :  { %v71_v32 = vadd.f32 %v69_v21, %v67_v17  ;;  %p192_p6 = pnand %p191_p5, %p185_p2 }
  0x2e   :  { %v72_v29 = vmul.f32 %v64_v15, %v64_v15  ;;  %v73_v33 = vmul.f32 %v65_v20, %v65_v20 }
  0x30   :  { %v74_v38 = vmul.f32 %v72_v29, %v70_v28  ;;  %v75_v40 = vmul.f32 %v73_v33, %v71_v32 }
  0x31   :  { %v133_v12 = vpop.eup %132 }
  0x32   :  { %v77_v13 = vmul.f32 0.6931472, %v133_v12  ;;  %v135_v14 = vpop.eup %134 }
  0x33   :  { %v137_v19 = vpop.eup %136  ;;  %v79_v22 = vmul.f32 0.6931472, %v135_v14 }
  0x34   :  { %v80_v23 = vmax.f32 %v77_v13, -100.0  ;;  %v139_v24 = vpop.eup %138  ;;  %v83_v25 = vmul.f32 0.6931472, %v137_v19 }
  0x35   :  { %v81_v26 = vmax.f32 %v79_v22, -100.0  ;;  %v85_v27 = vmul.f32 0.6931472, %v139_v24 }
  0x36   :  { %v86_v30 = vmax.f32 %v83_v25, -100.0  ;;  %v88_v31 = vmul.f32 %v80_v23, %v54_v4 }
  0x37   :  { %v87_v34 = vmax.f32 %v85_v27, -100.0  ;;  %v89_v35 = vmul.f32 %v81_v26, %v55_v5 }
  0x38   :  { %v90_v36 = vmul.f32 %v86_v30, %v60_v6 }
  0x39   :  { %v91_v37 = vmul.f32 %v87_v34, %v61_v7 }
  0x3a   :  { %v92_v39 = vadd.f32 %v90_v36, %v88_v31 }
  0x3b   :  { %v93_v41 = vadd.f32 %v91_v37, %v89_v35 }
  0x3c   :  { %v94_v42 = vsub.f32 0.0, %v92_v39 }
  0x3d   :  { %v95_v43 = vsub.f32 0.0, %v93_v41 }
  0x3e   :  { %v96_v44 = vmul.f32 %v94_v42, %v74_v38 }
  0x3f   :  { %v97_v45 = vmul.f32 %v95_v43, %v75_v40 }
  0x41   :  { %v98_v46 = vadd.f32 %v97_v45, %v96_v44 }
  0x43   :  { %103 = vst [vmem:[#allocation7] sm:$0xff] %v98_v46 }
  0x44   :  { %195 = shalt.err (!%p192_p6)
}
  0x45   :  { %s196_s10 = scalar_lea.hbm %s270_s2, 128 }
  0x46   :  { %p197_p7 = scmp.ne.s32.totalorder %s270_s2, %s196_s10  ;;  %p200_p8 = scmp.lt.u32.totalorder %s196_s10, %s270_s2 }
  0x48   :  { %p202_p9 = pnand %p200_p8, %p197_p7 }
  0x4a   :  { %205 = shalt.err (!%p202_p9)
}
  0x4b   :  { %120 = dma.vmem_to_hbm [thread:$0]  %s118_s6, 128, %s270_s2, [#allocation4]  }
  0x4c   :  { %210 = dma.done.wait [#allocation4], 128  }
  0x4d   :  { %211 = vsyncadd [#allocation4], 4294967168 }
  0x4e   :  { %124 = vsyncpa [#allocation3], 1 }
  0x4f   :  { %125 = vsyncpa [#allocation6], 1 }
  0x50   :  { %126 = vsyncpa [#allocation4], 1 }

</bundles_post_ra>
